<compile_context>
chip_gen: v5e
topology: v5e:2x2
jax: 0.10.0
libtpu: 0.0.40
codegen_flags: <defaults>
</compile_context>

<pallas_src>
import functools

import jax
import jax.numpy as jnp
from jax.experimental import pallas as pl
from jax.experimental.pallas import tpu as pltpu


def _round_up(x, m):
    return ((x + m - 1) // m) * m


def _mlp_kernel(*refs, num_branches):
    # refs layout: x_1..x_n (tile_b, D) bf16, W1 (D, Hp) bf16, b1 (1, Hp) f32,
    #              W2 (Hp, Ep) bf16, b2 (1, Ep) f32, o_1..o_n (tile_b, Ep) f32
    xs = refs[:num_branches]
    w1_ref, b1_ref, w2_ref, b2_ref = refs[num_branches:num_branches + 4]
    outs = refs[num_branches + 4:]

    w1 = w1_ref[...]
    b1 = b1_ref[...]
    w2 = w2_ref[...]
    b2 = b2_ref[...]

    for x_ref, o_ref in zip(xs, outs):
        h = jnp.dot(x_ref[...], w1, preferred_element_type=jnp.float32) + b1
        h = jnp.maximum(h, 0.0)  # ReLU
        out = jnp.dot(h.astype(w2.dtype), w2,
                      preferred_element_type=jnp.float32) + b2
        o_ref[...] = out.astype(o_ref.dtype)


def mlp_embed_pallas(xs, w1, b1, w2, b2, *, max_tile_b=256):
    """Apply the shared embedding MLP to each [N, D] array in `xs`.

    xs: tuple of float arrays, all [N, D].  Weights are already lane-padded:
    w1 [D, Hp] bf16, b1 [1, Hp] f32, w2 [Hp, Ep] bf16, b2 [1, Ep] f32.
    Returns a tuple of [N, Ep] float32 arrays (caller slices to true emb dim).
    """
    nb = len(xs)
    n, d = xs[0].shape
    hp = w1.shape[1]
    ep = w2.shape[1]

    # Adaptive batch tile: large (256) for real batches, sublane-rounded for tiny ones.
    tile_b = min(max_tile_b, _round_up(n, 8))
    n_pad = _round_up(n, tile_b)

    xs_p = []
    for x in xs:
        x = x.astype(jnp.bfloat16)
        if n_pad != n:
            x = jnp.pad(x, ((0, n_pad - n), (0, 0)))
        xs_p.append(x)

    grid = (n_pad // tile_b,)

    x_spec = pl.BlockSpec((tile_b, d), lambda i: (i, 0))
    o_spec = pl.BlockSpec((tile_b, ep), lambda i: (i, 0))
    const = lambda i: (0, 0)

    flops = 2 * nb * n_pad * (d * hp + hp * ep)
    bytes_accessed = (nb * n_pad * d * 2                 # bf16 x streams
                      + (d * hp + hp * ep) * 2           # bf16 weights
                      + (hp + ep) * 4                    # f32 biases
                      + nb * n_pad * ep * 4)             # f32 outputs

    outs = pl.pallas_call(
        functools.partial(_mlp_kernel, num_branches=nb),
        out_shape=tuple(
            jax.ShapeDtypeStruct((n_pad, ep), jnp.float32) for _ in range(nb)
        ),
        grid_spec=pltpu.PrefetchScalarGridSpec(
            num_scalar_prefetch=0,
            grid=grid,
            in_specs=[x_spec] * nb + [
                pl.BlockSpec((d, hp), const),   # W1 (resident)
                pl.BlockSpec((1, hp), const),   # b1
                pl.BlockSpec((hp, ep), const),  # W2 (resident)
                pl.BlockSpec((1, ep), const),   # b2
            ],
            out_specs=tuple(o_spec for _ in range(nb)),
        ),
        compiler_params=pltpu.CompilerParams(
            dimension_semantics=("parallel",),
            vmem_limit_bytes=64 * 1024 * 1024,
        ),
        cost_estimate=pl.CostEstimate(
            flops=flops, transcendentals=0, bytes_accessed=bytes_accessed
        ),
    )(*xs_p, w1, b1, w2, b2)

    return tuple(o[:n] for o in outs)


class TripletNetPallas:
    """JAX/Pallas port of TripletNet with a concrete MLP embedding_net."""

    def __init__(self, in_dim, hidden_dim, emb_dim, key):
        k1, k2, k3, k4 = jax.random.split(key, 4)
        # f32 master parameters ([in, out] layout = transpose of torch nn.Linear.weight).
        self.w1_f32 = jax.random.normal(k1, (in_dim, hidden_dim), jnp.float32) * 0.02
        self.b1_f32 = jax.random.normal(k2, (hidden_dim,), jnp.float32) * 0.01
        self.w2_f32 = jax.random.normal(k3, (hidden_dim, emb_dim), jnp.float32) * 0.02
        self.b2_f32 = jax.random.normal(k4, (emb_dim,), jnp.float32) * 0.01

        self.emb_dim = emb_dim
        hp = _round_up(hidden_dim, 128)
        ep = _round_up(emb_dim, 128)

        # Lane-padded kernel parameters: bf16 weights (MXU / HBM bandwidth),
        # f32 biases (added post-accumulation). Zero padding keeps math exact.
        self.w1 = jnp.pad(
            self.w1_f32, ((0, 0), (0, hp - hidden_dim))
        ).astype(jnp.bfloat16)
        self.b1 = jnp.pad(self.b1_f32, (0, hp - hidden_dim)).reshape(1, hp)
        self.w2 = jnp.pad(
            self.w2_f32, ((0, hp - hidden_dim), (0, ep - emb_dim))
        ).astype(jnp.bfloat16)
        self.b2 = jnp.pad(self.b2_f32, (0, ep - emb_dim)).reshape(1, ep)

    def get_embedding(self, x):
        # x: NCHW [B, C, H, W] -> flatten to [B, C*H*W] (row-major, matches torch .view)
        b = x.shape[0]
        x_flat = x.reshape(b, -1)
        (emb,) = mlp_embed_pallas(
            (x_flat,), self.w1, self.b1, self.w2, self.b2
        )
        return emb[:, : self.emb_dim]

    def __call__(self, x1, x2, x3):
        # forward(x1, x2, x3): apply the shared embedding_net to each input.
        b = x1.shape[0]
        xs = (x1.reshape(b, -1), x2.reshape(b, -1), x3.reshape(b, -1))
        o1, o2, o3 = mlp_embed_pallas(xs, self.w1, self.b1, self.w2, self.b2)
        e = self.emb_dim
        return o1[:, :e], o2[:, :e], o3[:, :e]


if __name__ == "__main__":
    key = jax.random.PRNGKey(0)
    k_params, kx1, kx2, kx3 = jax.random.split(key, 4)

    B, C, H, W = 2, 4, 16, 16      # NCHW inputs
    IN_DIM = C * H * W             # 1024
    HIDDEN = 32
    EMB = 32

    model = TripletNetPallas(IN_DIM, HIDDEN, EMB, k_params)

    x1 = jax.random.normal(kx1, (B, C, H, W), jnp.float32)
    x2 = jax.random.normal(kx2, (B, C, H, W), jnp.float32)
    x3 = jax.random.normal(kx3, (B, C, H, W), jnp.float32)

    o1, o2, o3 = model(x1, x2, x3)
    jax.block_until_ready((o1, o2, o3))

    # Sanity: compare against a pure-f32 JAX reference of the same embedding net.
    # (Kernel streams bf16 inputs/weights with f32 accumulation -> loosened tol.)
    def ref_embed(x):
        xf = x.reshape(x.shape[0], -1)
        h = jnp.maximum(xf @ model.w1_f32 + model.b1_f32, 0.0)
        return h @ model.w2_f32 + model.b2_f32

    r1, r2, r3 = ref_embed(x1), ref_embed(x2), ref_embed(x3)
    assert o1.shape == (B, EMB) and o2.shape == (B, EMB) and o3.shape == (B, EMB)
    assert jnp.allclose(o1, r1, atol=3e-2, rtol=3e-2)
    assert jnp.allclose(o2, r2, atol=3e-2, rtol=3e-2)
    assert jnp.allclose(o3, r3, atol=3e-2, rtol=3e-2)

    # get_embedding path (single-branch) sanity check.
    g1 = model.get_embedding(x1)
    jax.block_until_ready(g1)
    assert g1.shape == (B, EMB)
    assert jnp.allclose(g1, r1, atol=3e-2, rtol=3e-2)

    print("KERNEL_OK")
</pallas_src>

<mosaic_0001>
module attributes {stable_mosaic.version = 11 : i64} {
  func.func @_mlp_kernel(%arg0: i32, %arg1: memref<8x1024xbf16, #tpu.memory_space<vmem>>, %arg2: memref<8x1024xbf16, #tpu.memory_space<vmem>>, %arg3: memref<8x1024xbf16, #tpu.memory_space<vmem>>, %arg4: memref<1024x128xbf16, #tpu.memory_space<vmem>>, %arg5: memref<1x128xf32, #tpu.memory_space<vmem>>, %arg6: memref<128x128xbf16, #tpu.memory_space<vmem>>, %arg7: memref<1x128xf32, #tpu.memory_space<vmem>>, %arg8: memref<8x128xf32, #tpu.memory_space<vmem>>, %arg9: memref<8x128xf32, #tpu.memory_space<vmem>>, %arg10: memref<8x128xf32, #tpu.memory_space<vmem>>) attributes {dimension_semantics = [#tpu.dimension_semantics<parallel>], iteration_bounds = array<i64: 1>, scalar_prefetch = 0 : i64, scratch_operands = 0 : i64, tpu.core_type = #tpu.core_type<tc>, window_params = [{transform_indices = @transform_0, window_bounds = array<i64: 8, 1024>}, {transform_indices = @transform_1, window_bounds = array<i64: 8, 1024>}, {transform_indices = @transform_2, window_bounds = array<i64: 8, 1024>}, {pipeline_mode = #tpu.pipeline_mode<synchronous>, transform_indices = @transform_3, window_bounds = array<i64: 1024, 128>}, {pipeline_mode = #tpu.pipeline_mode<synchronous>, transform_indices = @transform_4, window_bounds = array<i64: 1, 128>}, {pipeline_mode = #tpu.pipeline_mode<synchronous>, transform_indices = @transform_5, window_bounds = array<i64: 128, 128>}, {pipeline_mode = #tpu.pipeline_mode<synchronous>, transform_indices = @transform_6, window_bounds = array<i64: 1, 128>}, {transform_indices = @transform_7, window_bounds = array<i64: 8, 128>}, {transform_indices = @transform_8, window_bounds = array<i64: 8, 128>}, {transform_indices = @transform_9, window_bounds = array<i64: 8, 128>}]} {
    %c0 = arith.constant 0 : index
    %c0_0 = arith.constant 0 : index
    %0 = vector.load %arg4[%c0, %c0_0] : memref<1024x128xbf16, #tpu.memory_space<vmem>>, vector<1024x128xbf16>
    %c0_1 = arith.constant 0 : index
    %c0_2 = arith.constant 0 : index
    %1 = vector.load %arg5[%c0_1, %c0_2] : memref<1x128xf32, #tpu.memory_space<vmem>>, vector<1x128xf32>
    %c0_3 = arith.constant 0 : index
    %c0_4 = arith.constant 0 : index
    %2 = vector.load %arg6[%c0_3, %c0_4] : memref<128x128xbf16, #tpu.memory_space<vmem>>, vector<128x128xbf16>
    %c0_5 = arith.constant 0 : index
    %c0_6 = arith.constant 0 : index
    %3 = vector.load %arg7[%c0_5, %c0_6] : memref<1x128xf32, #tpu.memory_space<vmem>>, vector<1x128xf32>
    %c0_7 = arith.constant 0 : index
    %c0_8 = arith.constant 0 : index
    %4 = vector.load %arg1[%c0_7, %c0_8] : memref<8x1024xbf16, #tpu.memory_space<vmem>>, vector<8x1024xbf16>
    %cst = arith.constant dense<0.000000e+00> : vector<8x128xf32>
    %5 = tpu.matmul %4, %0, %cst {dimension_numbers = #tpu.dot_dimension_numbers<[1], [0], [0], [1], [0, 0, 1, 1], [], []>} : vector<8x1024xbf16>, vector<1024x128xbf16>, vector<8x128xf32> -> vector<8x128xf32>
    %6 = vector.broadcast %1 : vector<1x128xf32> to vector<8x128xf32>
    %7 = arith.addf %5, %6 : vector<8x128xf32>
    %cst_9 = arith.constant 0.000000e+00 : f32
    %8 = vector.broadcast %cst_9 : f32 to vector<8x128xf32>
    %9 = arith.maximumf %7, %8 : vector<8x128xf32>
    %10 = arith.truncf %9 : vector<8x128xf32> to vector<8x128xbf16>
    %cst_10 = arith.constant dense<0.000000e+00> : vector<8x128xf32>
    %11 = tpu.matmul %10, %2, %cst_10 {dimension_numbers = #tpu.dot_dimension_numbers<[1], [0], [0], [1], [0, 0, 1, 1], [], []>} : vector<8x128xbf16>, vector<128x128xbf16>, vector<8x128xf32> -> vector<8x128xf32>
    %12 = vector.broadcast %3 : vector<1x128xf32> to vector<8x128xf32>
    %13 = arith.addf %11, %12 : vector<8x128xf32>
    %c0_11 = arith.constant 0 : index
    %c0_12 = arith.constant 0 : index
    %14 = vector.load %arg8[%c0_11, %c0_12] : memref<8x128xf32, #tpu.memory_space<vmem>>, vector<8x128xf32>
    tpu.vector_store %arg8[%c0_11, %c0_12], %13 {strides = array<i32>} : memref<8x128xf32, #tpu.memory_space<vmem>>, vector<8x128xf32>,
    %c0_13 = arith.constant 0 : index
    %c0_14 = arith.constant 0 : index
    %15 = vector.load %arg2[%c0_13, %c0_14] : memref<8x1024xbf16, #tpu.memory_space<vmem>>, vector<8x1024xbf16>
    %cst_15 = arith.constant dense<0.000000e+00> : vector<8x128xf32>
    %16 = tpu.matmul %15, %0, %cst_15 {dimension_numbers = #tpu.dot_dimension_numbers<[1], [0], [0], [1], [0, 0, 1, 1], [], []>} : vector<8x1024xbf16>, vector<1024x128xbf16>, vector<8x128xf32> -> vector<8x128xf32>
    %17 = vector.broadcast %1 : vector<1x128xf32> to vector<8x128xf32>
    %18 = arith.addf %16, %17 : vector<8x128xf32>
    %cst_16 = arith.constant 0.000000e+00 : f32
    %19 = vector.broadcast %cst_16 : f32 to vector<8x128xf32>
    %20 = arith.maximumf %18, %19 : vector<8x128xf32>
    %21 = arith.truncf %20 : vector<8x128xf32> to vector<8x128xbf16>
    %cst_17 = arith.constant dense<0.000000e+00> : vector<8x128xf32>
    %22 = tpu.matmul %21, %2, %cst_17 {dimension_numbers = #tpu.dot_dimension_numbers<[1], [0], [0], [1], [0, 0, 1, 1], [], []>} : vector<8x128xbf16>, vector<128x128xbf16>, vector<8x128xf32> -> vector<8x128xf32>
    %23 = vector.broadcast %3 : vector<1x128xf32> to vector<8x128xf32>
    %24 = arith.addf %22, %23 : vector<8x128xf32>
    %c0_18 = arith.constant 0 : index
    %c0_19 = arith.constant 0 : index
    %25 = vector.load %arg9[%c0_18, %c0_19] : memref<8x128xf32, #tpu.memory_space<vmem>>, vector<8x128xf32>
    tpu.vector_store %arg9[%c0_18, %c0_19], %24 {strides = array<i32>} : memref<8x128xf32, #tpu.memory_space<vmem>>, vector<8x128xf32>,
    %c0_20 = arith.constant 0 : index
    %c0_21 = arith.constant 0 : index
    %26 = vector.load %arg3[%c0_20, %c0_21] : memref<8x1024xbf16, #tpu.memory_space<vmem>>, vector<8x1024xbf16>
    %cst_22 = arith.constant dense<0.000000e+00> : vector<8x128xf32>
    %27 = tpu.matmul %26, %0, %cst_22 {dimension_numbers = #tpu.dot_dimension_numbers<[1], [0], [0], [1], [0, 0, 1, 1], [], []>} : vector<8x1024xbf16>, vector<1024x128xbf16>, vector<8x128xf32> -> vector<8x128xf32>
    %28 = vector.broadcast %1 : vector<1x128xf32> to vector<8x128xf32>
    %29 = arith.addf %27, %28 : vector<8x128xf32>
    %cst_23 = arith.constant 0.000000e+00 : f32
    %30 = vector.broadcast %cst_23 : f32 to vector<8x128xf32>
    %31 = arith.maximumf %29, %30 : vector<8x128xf32>
    %32 = arith.truncf %31 : vector<8x128xf32> to vector<8x128xbf16>
    %cst_24 = arith.constant dense<0.000000e+00> : vector<8x128xf32>
    %33 = tpu.matmul %32, %2, %cst_24 {dimension_numbers = #tpu.dot_dimension_numbers<[1], [0], [0], [1], [0, 0, 1, 1], [], []>} : vector<8x128xbf16>, vector<128x128xbf16>, vector<8x128xf32> -> vector<8x128xf32>
    %34 = vector.broadcast %3 : vector<1x128xf32> to vector<8x128xf32>
    %35 = arith.addf %33, %34 : vector<8x128xf32>
    %c0_25 = arith.constant 0 : index
    %c0_26 = arith.constant 0 : index
    %36 = vector.load %arg10[%c0_25, %c0_26] : memref<8x128xf32, #tpu.memory_space<vmem>>, vector<8x128xf32>
    tpu.vector_store %arg10[%c0_25, %c0_26], %35 {strides = array<i32>} : memref<8x128xf32, #tpu.memory_space<vmem>>, vector<8x128xf32>,
    return
  }
  func.func @transform_0(%arg0: i32) -> (i32, i32) {
    %c0_i32 = arith.constant 0 : i32
    %c0_i32_0 = arith.constant 0 : i32
    return %arg0, %c0_i32 : i32, i32
  }
  func.func @transform_1(%arg0: i32) -> (i32, i32) {
    %c0_i32 = arith.constant 0 : i32
    %c0_i32_0 = arith.constant 0 : i32
    return %arg0, %c0_i32 : i32, i32
  }
  func.func @transform_2(%arg0: i32) -> (i32, i32) {
    %c0_i32 = arith.constant 0 : i32
    %c0_i32_0 = arith.constant 0 : i32
    return %arg0, %c0_i32 : i32, i32
  }
  func.func @transform_3(%arg0: i32) -> (i32, i32) {
    %c0_i32 = arith.constant 0 : i32
    %c0_i32_0 = arith.constant 0 : i32
    %c0_i32_1 = arith.constant 0 : i32
    return %c0_i32, %c0_i32_0 : i32, i32
  }
  func.func @transform_4(%arg0: i32) -> (i32, i32) {
    %c0_i32 = arith.constant 0 : i32
    %c0_i32_0 = arith.constant 0 : i32
    %c0_i32_1 = arith.constant 0 : i32
    return %c0_i32, %c0_i32_0 : i32, i32
  }
  func.func @transform_5(%arg0: i32) -> (i32, i32) {
    %c0_i32 = arith.constant 0 : i32
    %c0_i32_0 = arith.constant 0 : i32
    %c0_i32_1 = arith.constant 0 : i32
    return %c0_i32, %c0_i32_0 : i32, i32
  }
  func.func @transform_6(%arg0: i32) -> (i32, i32) {
    %c0_i32 = arith.constant 0 : i32
    %c0_i32_0 = arith.constant 0 : i32
    %c0_i32_1 = arith.constant 0 : i32
    return %c0_i32, %c0_i32_0 : i32, i32
  }
  func.func @transform_7(%arg0: i32) -> (i32, i32) {
    %c0_i32 = arith.constant 0 : i32
    %c0_i32_0 = arith.constant 0 : i32
    return %arg0, %c0_i32 : i32, i32
  }
  func.func @transform_8(%arg0: i32) -> (i32, i32) {
    %c0_i32 = arith.constant 0 : i32
    %c0_i32_0 = arith.constant 0 : i32
    return %arg0, %c0_i32 : i32, i32
  }
  func.func @transform_9(%arg0: i32) -> (i32, i32) {
    %c0_i32 = arith.constant 0 : i32
    %c0_i32_0 = arith.constant 0 : i32
    return %arg0, %c0_i32 : i32, i32
  }
}

</mosaic_0001>

<bundles_post_ra>
// kernel: tpu_custom_call.1
= control target key start
LH: loop header
LB: loop body
LE: loop exit
PB: predicated region body
PF: predicated region fallthrough
CT: control target
= control target key end

     0   :  { %15 = vsyncpa [#allocation3], 0  ;;  %s2235_s0 = inlined_call_operand.hbm [shape: bf16[8,1024], index: 0, kind: input, shape index: {}]   ;;  %s2236_s1 = inlined_call_operand.hbm [shape: bf16[8,1024], index: 1, kind: input, shape index: {}]   ;;  %s2237_s2 = inlined_call_operand.hbm [shape: bf16[8,1024], index: 2, kind: input, shape index: {}]   ;;  %s2238_s3 = inlined_call_operand.hbm [shape: bf16[1024,128], index: 3, kind: input, shape index: {}]   ;;  %s2239_s4 = inlined_call_operand.vmem [shape: f32[1,128], index: 4, kind: input, shape index: {}]   ;;  %s2240_s5 = inlined_call_operand.hbm [shape: bf16[128,128], index: 5, kind: input, shape index: {}]   ;;  %s2241_s6 = inlined_call_operand.vmem [shape: f32[1,128], index: 6, kind: input, shape index: {}]   ;;  %s2242_s7 = inlined_call_operand.hbm [shape: f32[8,128], index: 7, kind: output, shape index: {0}]   ;;  %s2243_s8 = inlined_call_operand.hbm [shape: f32[8,128], index: 8, kind: output, shape index: {1}]   ;;  %s2244_s9 = inlined_call_operand.hbm [shape: f32[8,128], index: 9, kind: output, shape index: {2}]  }
   0x1   :  { %16 = vsyncpa [#allocation6], 0 }
   0x2   :  { %17 = vsyncpa [#allocation9], 0 }
   0x3   :  { %18 = vsyncpa [#allocation4], 0  ;;  %s36_s11 = sshll.u32 %s2236_s1, 4  ;;  %s37_s11 = int_to_ptr.hbm [resolvable:$true] %s36_s11 }
   0x4   :  { %19 = vsyncpa [#allocation13], 0  ;;  %s1767_s12 = smov [#allocation5]   ;;  %s57_s16 = sshll.u32 %s2238_s3, 4  ;;  %s58_s16 = int_to_ptr.hbm [resolvable:$true] %s57_s16 }
   0x5   :  { %s38_s13 = sshll.u32 %s1767_s12, 4  ;;  %s1768_s17 = smov [#allocation8]   ;;  %s39_s13 = int_to_ptr.vmem [resolvable:$true] %s38_s13 }
   0x6   :  { %41 = dma.hbm_to_vmem [thread:$0]  %s37_s11, 512, %s39_s13, [#allocation6]  }
   0x7   :  { %s59_s18 = sshll.u32 %s1768_s17, 4  ;;  %s1769_s19 = smov 64   ;;  %s60_s18 = int_to_ptr.vmem [resolvable:$true] %s59_s18 }
   0x8   :  { %s1770_s20 = smov 4   ;;  %s25_s1 = sshll.u32 %s2235_s0, 4  ;;  %s26_s1 = int_to_ptr.hbm [resolvable:$true] %s25_s1 }
   0x9   :  { %65 = dma.hbm_to_vmem [thread:$0]  %s58_s16, 8192, %s60_s18, [#allocation9], %s1769_s19, %s1769_s19, %s1770_s20  }
   0xa   :  { %s1771_s23 = smov [#allocation2]   ;;  %s47_s3 = sshll.u32 %s2237_s2, 4  ;;  %s48_s3 = int_to_ptr.hbm [resolvable:$true] %s47_s3 }
   0xb   :  { %s27_s24 = sshll.u32 %s1771_s23, 4  ;;  %s1772_s27 = smov [#allocation7]   ;;  %s28_s24 = int_to_ptr.vmem [resolvable:$true] %s27_s24 }
   0xc   :  { %30 = dma.hbm_to_vmem [thread:$0]  %s26_s1, 512, %s28_s24, [#allocation3]  }
   0xd   :  { %s49_s28 = sshll.u32 %s1772_s27, 4  ;;  %s72_s10 = sshll.u32 %s2240_s5, 4  ;;  %s50_s28 = int_to_ptr.vmem [resolvable:$true] %s49_s28  ;;  %s73_s10 = int_to_ptr.hbm [resolvable:$true] %s72_s10 }
   0xe   :  { %52 = dma.hbm_to_vmem [thread:$0]  %s48_s3, 512, %s50_s28, [#allocation6]  }
   0xf   :  { %s1773_s0 = smov [#allocation10]  }
  0x10   :  { %s74_s11 = sshll.u32 %s1773_s0, 4  ;;  %s75_s11 = int_to_ptr.vmem [resolvable:$true] %s74_s11 }
  0x11   :  { %80 = dma.hbm_to_vmem [thread:$0]  %s73_s10, 1024, %s75_s11, [#allocation9], %s1769_s19, %s1769_s19, %s1770_s20  }
  0x12   :  { %1757 = dma.done.wait [#allocation3], 512  }
  0x13   :  { %1758 = vsyncadd [#allocation3], 4294966784 }
  0x14   :  { %1759 = dma.done.wait [#allocation6], 1024  }
  0x15   :  { %1760 = vsyncadd [#allocation6], 4294966272 }
  0x16   :  { %1761 = dma.done.wait [#allocation9], 9216  }
  0x17   :  { %1762 = vsyncadd [#allocation9], 4294958080  ;;  %v1842_v0 = vld [vmem:[#allocation8 + $0x38] sm:$0xff]  ;;  %v1852_v4 = vld [vmem:[#allocation8 + $0x30] sm:$0xff]  ;;  %s1161_s14 = sshll.u32 %s2243_s8, 4  ;;  %s1774_s15 = smov [#allocation12]   ;;  %s1162_s14 = int_to_ptr.hbm [resolvable:$true] %s1161_s14 }
  0x18   :  { %v1844_v1 = vld [vmem:[#allocation8 + $0x78] sm:$0xff]  ;;  %668 = vmatpush.bf16.msra.mxu0 %v1842_v0  ;;  %v1854_v5 = vld [vmem:[#allocation8 + $0x70] sm:$0xff]  ;;  %v1864_v8 = vld [vmem:[#allocation8 + $0x28] sm:$0xff]  ;;  %s1159_s16 = sshll.u32 %s1774_s15, 4  ;;  %s1775_s17 = smov [#allocation11]   ;;  %s1160_s16 = int_to_ptr.vmem [resolvable:$true] %s1159_s16 }
  0x19   :  { %v1846_v2 = vld [vmem:[#allocation8 + $0xb8] sm:$0xff]  ;;  %681 = vmatpush.bf16.msra.mxu1 %v1844_v1  ;;  %v1858_v6 = vld [vmem:[#allocation8 + $0xb0] sm:$0xff]  ;;  %v1866_v9 = vld [vmem:[#allocation8 + $0x68] sm:$0xff]  ;;  %s1148_s18 = sshll.u32 %s1775_s17, 4  ;;  %s1150_s21 = sshll.u32 %s2242_s7, 4  ;;  %s1149_s18 = int_to_ptr.vmem [resolvable:$true] %s1148_s18  ;;  %s1151_s21 = int_to_ptr.hbm [resolvable:$true] %s1150_s21 }
  0x1a   :  { %2283 = vst [vmem:[#allocation20_spill] sm:$0xff] %v1846_v2  ;;  %v1848_v3 = vld [vmem:[#allocation8 + $0xf8] sm:$0xff]  ;;  %694 = vmatpush.bf16.msra.mxu2 %v1846_v2  ;;  %v1860_v7 = vld [vmem:[#allocation8 + $0xf0] sm:$0xff]  ;;  %v1870_v10 = vld [vmem:[#allocation8 + $0xa8] sm:$0xff]  ;;  %s1776_s22 = smov [#allocation14]   ;;  %s1172_s8 = sshll.u32 %s2244_s9, 4  ;;  %s1173_s8 = int_to_ptr.hbm [resolvable:$true] %s1172_s8 }
  0x1b   :  { %707 = vmatpush.bf16.msra.mxu3 %v1848_v3  ;;  %2284 = vst [vmem:[#allocation21_spill] sm:$0xff] %v1858_v6  ;;  %v1872_v11 = vld [vmem:[#allocation8 + $0xe8] sm:$0xff]  ;;  %v1876_v12 = vld [vmem:[#allocation8 + $0x20] sm:$0xff]  ;;  %v1888_v16 = vld [vmem:[#allocation8 + $0x18] sm:$0xff]  ;;  %s1170_s1 = sshll.u32 %s1776_s22, 4  ;;  %s1171_s1 = int_to_ptr.vmem [resolvable:$true] %s1170_s1 }
  0x1c   :  { %669 = vmatpush.bf16.msra.mxu0 %v1852_v4  ;;  %2285 = vst [vmem:[#allocation22_spill] sm:$0xff] %v1870_v10  ;;  %v1878_v13 = vld [vmem:[#allocation8 + $0x60] sm:$0xff]  ;;  %v1890_v17 = vld [vmem:[#allocation8 + $0x58] sm:$0xff]  ;;  %v1898_v20 = vld [vmem:[#allocation8 + $0x10] sm:$0xff] }
  0x1d   :  { %682 = vmatpush.bf16.msra.mxu1 %v1854_v5  ;;  %v1882_v14 = vld [vmem:[#allocation8 + $0xa0] sm:$0xff]  ;;  %v1894_v18 = vld [vmem:[#allocation8 + $0x98] sm:$0xff]  ;;  %v1902_v21 = vld [vmem:[#allocation8 + $0x50] sm:$0xff] }
  0x1e   :  { %695 = vmatpush.bf16.msra.mxu2 %v1858_v6  ;;  %2286 = vst [vmem:[#allocation23_spill] sm:$0xff] %v1882_v14  ;;  %v1884_v15 = vld [vmem:[#allocation8 + $0xe0] sm:$0xff]  ;;  %v1896_v19 = vld [vmem:[#allocation8 + $0xd8] sm:$0xff]  ;;  %v1906_v22 = vld [vmem:[#allocation8 + $0x90] sm:$0xff] }
  0x1f   :  { %708 = vmatpush.bf16.msra.mxu3 %v1860_v7  ;;  %2287 = vst [vmem:[#allocation24_spill] sm:$0xff] %v1894_v18  ;;  %v1908_v23 = vld [vmem:[#allocation8 + $0xd0] sm:$0xff]  ;;  %v1912_v24 = vld [vmem:[#allocation8 + $0x8] sm:$0xff]  ;;  %v249_v29 = vld [vmem:[#allocation2] sm:$0xff] }
  0x20   :  { %670 = vmatpush.bf16.msra.mxu0 %v1864_v8  ;;  %2288 = vst [vmem:[#allocation25_spill] sm:$0xff] %v1896_v19  ;;  %v1914_v25 = vld [vmem:[#allocation8 + $0x48] sm:$0xff]  ;;  %v1924_v30 = vld [vmem:[#allocation8] sm:$0xff]  ;;  %v260_v33 = vunpack.c.l.b16 %v249_v29  ;;  %v261_v37 = vunpack.c.h.b16 %v249_v29  ;;  %v1934_v38 = vld [vmem:[#allocation8 + $0x138] sm:$0xff] }
  0x21   :  { %683 = vmatpush.bf16.msra.mxu1 %v1866_v9  ;;  %2289 = vst [vmem:[#allocation26_spill] sm:$0xff] %v1906_v22  ;;  %v1916_v26 = vld [vmem:[#allocation8 + $0x88] sm:$0xff]  ;;  %v1926_v31 = vld [vmem:[#allocation8 + $0x40] sm:$0xff]  ;;  %v1936_v39 = vld [vmem:[#allocation8 + $0x178] sm:$0xff] }
  0x22   :  { %696 = vmatpush.bf16.msra.mxu2 %v1870_v10  ;;  %2290 = vst [vmem:[#allocation27_spill] sm:$0xff] %v1908_v23  ;;  %v1920_v27 = vld [vmem:[#allocation8 + $0xc8] sm:$0xff]  ;;  %v1930_v34 = vld [vmem:[#allocation8 + $0x80] sm:$0xff]  ;;  %v1938_v40 = vld [vmem:[#allocation8 + $0x1b8] sm:$0xff]  ;;  %v268_v43 = vpack.c.b16 %v260_v33, %v260_v33  ;;  %v269_v45 = vpack.c.b16 %v261_v37, %v261_v37 }
  0x23   :  { %709 = vmatpush.bf16.msra.mxu3 %v1872_v11  ;;  %2291 = vst [vmem:[#allocation28_spill] sm:$0xff] %v1916_v26  ;;  %v250_v28 = vld [vmem:[#allocation2 + $0x8] sm:$0xff]  ;;  %v1932_v35 = vld [vmem:[#allocation8 + $0xc0] sm:$0xff]  ;;  %v1940_v41 = vld [vmem:[#allocation8 + $0x1f8] sm:$0xff] }
  0x24   :  { %671 = vmatpush.bf16.msra.mxu0 %v1876_v12  ;;  %2292 = vst [vmem:[#allocation29_spill] sm:$0xff] %v1920_v27  ;;  %v262_v32 = vunpack.c.l.b16 %v250_v28  ;;  %v263_v36 = vunpack.c.h.b16 %v250_v28  ;;  %v1948_v46 = vld [vmem:[#allocation8 + $0x130] sm:$0xff]  ;;  %v1960_v50 = vld [vmem:[#allocation8 + $0x128] sm:$0xff]  ;;  %v1972_v54 = vld [vmem:[#allocation8 + $0x120] sm:$0xff] }
  0x25   :  { %684 = vmatpush.bf16.msra.mxu1 %v1878_v13  ;;  %2293 = vst [vmem:[#allocation30_spill] sm:$0xff] %v1930_v34  ;;  %v1950_v47 = vld [vmem:[#allocation8 + $0x170] sm:$0xff]  ;;  %v1962_v51 = vld [vmem:[#allocation8 + $0x168] sm:$0xff]  ;;  %v1974_v55 = vld [vmem:[#allocation8 + $0x160] sm:$0xff] }
  0x26   :  { %697 = vmatpush.bf16.msra.mxu2 %v1882_v14  ;;  %2294 = vst [vmem:[#allocation31_spill] sm:$0xff] %v1932_v35  ;;  %v270_v42 = vpack.c.b16 %v262_v32, %v262_v32  ;;  %v271_v44 = vpack.c.b16 %v263_v36, %v263_v36  ;;  %v1954_v48 = vld [vmem:[#allocation8 + $0x1b0] sm:$0xff]  ;;  %v1966_v52 = vld [vmem:[#allocation8 + $0x1a8] sm:$0xff]  ;;  %v1978_v56 = vld [vmem:[#allocation8 + $0x1a0] sm:$0xff] }
  0x27   :  { %710 = vmatpush.bf16.msra.mxu3 %v1884_v15  ;;  %2295 = vst [vmem:[#allocation32_spill] sm:$0xff] %v1938_v40  ;;  %v1956_v49 = vld [vmem:[#allocation8 + $0x1f0] sm:$0xff]  ;;  %v1968_v53 = vld [vmem:[#allocation8 + $0x1e8] sm:$0xff]  ;;  %v1980_v57 = vld [vmem:[#allocation8 + $0x1e0] sm:$0xff] }
  0x28   :  { %672 = vmatpush.bf16.msra.mxu0 %v1888_v16  ;;  %2296 = vst [vmem:[#allocation33_spill] sm:$0xff] %v1940_v41  ;;  %v1984_v58 = vld [vmem:[#allocation8 + $0x118] sm:$0xff]  ;;  %v1996_v62 = vld [vmem:[#allocation8 + $0x110] sm:$0xff]  ;;  %v2008_v32 = vld [vmem:[#allocation8 + $0x108] sm:$0xff] }
  0x29   :  { %685 = vmatpush.bf16.msra.mxu1 %v1890_v17  ;;  %2297 = vst [vmem:[#allocation34_spill] sm:$0xff] %v1954_v48  ;;  %v1986_v59 = vld [vmem:[#allocation8 + $0x158] sm:$0xff]  ;;  %v1998_v63 = vld [vmem:[#allocation8 + $0x150] sm:$0xff]  ;;  %v2010_v33 = vld [vmem:[#allocation8 + $0x148] sm:$0xff] }
  0x2a   :  { %698 = vmatpush.bf16.msra.mxu2 %v1894_v18  ;;  %2298 = vst [vmem:[#allocation35_spill] sm:$0xff] %v1956_v49  ;;  %v1990_v60 = vld [vmem:[#allocation8 + $0x198] sm:$0xff]  ;;  %v2002_v28 = vld [vmem:[#allocation8 + $0x190] sm:$0xff]  ;;  %v2014_v37 = vld [vmem:[#allocation8 + $0x188] sm:$0xff] }
  0x2b   :  { %711 = vmatpush.bf16.msra.mxu3 %v1896_v19  ;;  %2299 = vst [vmem:[#allocation36_spill] sm:$0xff] %v1966_v52  ;;  %v1992_v61 = vld [vmem:[#allocation8 + $0x1d8] sm:$0xff]  ;;  %v2004_v29 = vld [vmem:[#allocation8 + $0x1d0] sm:$0xff] }
  0x2c   :  { %673 = vmatpush.bf16.msra.mxu0 %v1898_v20  ;;  %2300 = vst [vmem:[#allocation37_spill] sm:$0xff] %v1968_v53  ;;  %v251_v36 = vld [vmem:[#allocation2 + $0x10] sm:$0xff] }
  0x2d   :  { %686 = vmatpush.bf16.msra.mxu1 %v1902_v21  ;;  %2301 = vst [vmem:[#allocation38_spill] sm:$0xff] %v1978_v56 }
  0x2e   :  { %699 = vmatpush.bf16.msra.mxu2 %v1906_v22  ;;  %2302 = vst [vmem:[#allocation39_spill] sm:$0xff] %v1980_v57 }
  0x2f   :  { %712 = vmatpush.bf16.msra.mxu3 %v1908_v23  ;;  %2303 = vst [vmem:[#allocation40_spill] sm:$0xff] %v1990_v60 }
  0x30   :  { %674 = vmatpush.bf16.msra.mxu0 %v1912_v24  ;;  %2304 = vst [vmem:[#allocation41_spill] sm:$0xff] %v1992_v61 }
  0x31   :  { %687 = vmatpush.bf16.msra.mxu1 %v1914_v25  ;;  %2305 = vst [vmem:[#allocation42_spill] sm:$0xff] %v2002_v28 }
  0x32   :  { %700 = vmatpush.bf16.msra.mxu2 %v1916_v26  ;;  %2306 = vst [vmem:[#allocation43_spill] sm:$0xff] %v2004_v29 }
  0x33   :  { %713 = vmatpush.bf16.msra.mxu3 %v1920_v27  ;;  %2307 = vst [vmem:[#allocation44_spill] sm:$0xff] %v2014_v37 }
  0x34   :  { %675 = vmatpush.bf16.msra.mxu0 %v1924_v30 }
  0x35   :  { %688 = vmatpush.bf16.msra.mxu1 %v1926_v31 }
  0x36   :  { %701 = vmatpush.bf16.msra.mxu2 %v1930_v34 }
  0x37   :  { %714 = vmatpush.bf16.msra.mxu3 %v1932_v35  ;;  %676 = vmatmul.bf16.vlgmr.msra.gmra.mxu0 %v268_v43  ;;  %v252_v43 = vld [vmem:[#allocation2 + $0x18] sm:$0xff] }
  0x38   :  { %720 = vmatpush.bf16.msrb.mxu0 %v1934_v38  ;;  %689 = vmatmul.bf16.vlgmr.msra.gmra.mxu1 %v269_v45  ;;  %v265_v45 = vunpack.c.h.b16 %v251_v36  ;;  %v2030_v35 = vld [vmem:[#allocation10 + $0x38] sm:$0xff] }
  0x39   :  { %733 = vmatpush.bf16.msrb.mxu1 %v1936_v39  ;;  %702 = vmatmul.bf16.vlgmr.msra.gmra.mxu2 %v270_v42  ;;  %v2016_v42 = vld [vmem:[#allocation8 + $0x1c8] sm:$0xff] }
  0x3a   :  { %746 = vmatpush.bf16.msrb.mxu2 %v1938_v40  ;;  %715 = vmatmul.bf16.vlgmr.msra.gmra.mxu3 %v271_v44  ;;  %v264_v44 = vunpack.c.l.b16 %v251_v36  ;;  %v273_v27 = vpack.c.b16 %v265_v45, %v265_v45  ;;  %v2310_v45 = vld [vmem:[#allocation25_spill] sm:$0xff] }
  0x3b   :  { %759 = vmatpush.bf16.msrb.mxu3 %v1940_v41  ;;  %v2028_v41 = vld [vmem:[#allocation8 + $0x1c0] sm:$0xff] }
  0x3c   :  { %721 = vmatpush.bf16.msrb.mxu0 %v1948_v46  ;;  %2309 = vst [vmem:[#allocation46_spill] sm:$0xff] %v2028_v41  ;;  %v272_v36 = vpack.c.b16 %v264_v44, %v264_v44  ;;  %v2103_v44 = vld [vmem:[#allocation10] sm:$0xff] }
  0x3d   :  { %734 = vmatpush.bf16.msrb.mxu1 %v1950_v47 }
  0x3e   :  { %747 = vmatpush.bf16.msrb.mxu2 %v1954_v48 }
  0x3f   :  { %760 = vmatpush.bf16.msrb.mxu3 %v1956_v49  ;;  %v267_v49 = vunpack.c.h.b16 %v252_v43 }
  0x40   :  { %722 = vmatpush.bf16.msrb.mxu0 %v1960_v50 }
  0x41   :  { %735 = vmatpush.bf16.msrb.mxu1 %v1962_v51  ;;  %v275_v19 = vpack.c.b16 %v267_v49, %v267_v49  ;;  %v2043_v49 = vld [vmem:[#allocation10 + $0x28] sm:$0xff] }
  0x42   :  { %748 = vmatpush.bf16.msrb.mxu2 %v1966_v52 }
  0x43   :  { %761 = vmatpush.bf16.msrb.mxu3 %v1968_v53  ;;  %v266_v53 = vunpack.c.l.b16 %v252_v43  ;;  %v2037_v43 = vld [vmem:[#allocation10 + $0x30] sm:$0xff] }
  0x44   :  { %723 = vmatpush.bf16.msrb.mxu0 %v1972_v54 }
  0x45   :  { %736 = vmatpush.bf16.msrb.mxu1 %v1974_v55  ;;  %v274_v23 = vpack.c.b16 %v266_v53, %v266_v53  ;;  %v2049_v53 = vld [vmem:[#allocation10 + $0x20] sm:$0xff] }
  0x46   :  { %749 = vmatpush.bf16.msrb.mxu2 %v1978_v56 }
  0x47   :  { %762 = vmatpush.bf16.msrb.mxu3 %v1980_v57  ;;  %v2022_v57 = vld [vmem:[#allocation8 + $0x140] sm:$0xff] }
  0x48   :  { %724 = vmatpush.bf16.msrb.mxu0 %v1984_v58 }
  0x49   :  { %737 = vmatpush.bf16.msrb.mxu1 %v1986_v59 }
  0x4a   :  { %750 = vmatpush.bf16.msrb.mxu2 %v1990_v60 }
  0x4b   :  { %763 = vmatpush.bf16.msrb.mxu3 %v1992_v61  ;;  %v2020_v61 = vld [vmem:[#allocation8 + $0x100] sm:$0xff] }
  0x4c   :  { %725 = vmatpush.bf16.msrb.mxu0 %v1996_v62 }
  0x4d   :  { %738 = vmatpush.bf16.msrb.mxu1 %v1998_v63 }
  0x4e   :  { %751 = vmatpush.bf16.msrb.mxu2 %v2002_v28 }
  0x4f   :  { %764 = vmatpush.bf16.msrb.mxu3 %v2004_v29  ;;  %v2026_v29 = vld [vmem:[#allocation8 + $0x180] sm:$0xff] }
  0x50   :  { %726 = vmatpush.bf16.msrb.mxu0 %v2008_v32  ;;  %2308 = vst [vmem:[#allocation45_spill] sm:$0xff] %v2026_v29 }
  0x51   :  { %739 = vmatpush.bf16.msrb.mxu1 %v2010_v33 }
  0x52   :  { %752 = vmatpush.bf16.msrb.mxu2 %v2014_v37 }
  0x53   :  { %765 = vmatpush.bf16.msrb.mxu3 %v2016_v42 }
  0x54   :  { %727 = vmatpush.bf16.msrb.mxu0 %v2020_v61 }
  0x55   :  { %740 = vmatpush.bf16.msrb.mxu1 %v2022_v57 }
  0x56   :  { %753 = vmatpush.bf16.msrb.mxu2 %v2026_v29 }
  0x57   :  { %766 = vmatpush.bf16.msrb.mxu3 %v2028_v41  ;;  %728 = vmatmul.bf16.vlgmr.msrb.gmra.mxu0 %v272_v36 }
  0x58   :  { %825 = vmatpush.bf16.msra.mxu0 %v2030_v35  ;;  %741 = vmatmul.bf16.vlgmr.msrb.gmra.mxu1 %v273_v27  ;;  %v2100_v27 = vld [vmem:[#allocation10 + $0x8] sm:$0xff] }
  0x59   :  { %754 = vmatmul.bf16.vlgmr.msrb.gmra.mxu2 %v274_v23  ;;  %871 = vmatpush.bf16.msra.mxu1 %v1842_v0  ;;  %v2097_v23 = vld [vmem:[#allocation10 + $0x10] sm:$0xff] }
  0x5a   :  { %884 = vmatpush.bf16.msra.mxu2 %v1844_v1  ;;  %767 = vmatmul.bf16.vlgmr.msrb.gmra.mxu3 %v275_v19  ;;  %v2055_v19 = vld [vmem:[#allocation10 + $0x18] sm:$0xff] }
  0x5b   :  { %897 = vmatpush.bf16.msra.mxu3 %v1846_v2  ;;  %v2121_v2 = vld [vmem:[%s2239_s4] ss:$0 sm:$0xff] }
  0x5c   :  { %826 = vmatpush.bf16.msra.mxu0 %v2037_v43 }
  0x5d   :  { %872 = vmatpush.bf16.msra.mxu1 %v1852_v4 }
  0x5e   :  { %885 = vmatpush.bf16.msra.mxu2 %v1854_v5 }
  0x5f   :  { %898 = vmatpush.bf16.msra.mxu3 %v1858_v6 }
  0x60   :  { %827 = vmatpush.bf16.msra.mxu0 %v2043_v49 }
  0x61   :  { %873 = vmatpush.bf16.msra.mxu1 %v1864_v8 }
  0x62   :  { %886 = vmatpush.bf16.msra.mxu2 %v1866_v9 }
  0x63   :  { %899 = vmatpush.bf16.msra.mxu3 %v1870_v10 }
  0x64   :  { %828 = vmatpush.bf16.msra.mxu0 %v2049_v53 }
  0x65   :  { %874 = vmatpush.bf16.msra.mxu1 %v1876_v12 }
  0x66   :  { %887 = vmatpush.bf16.msra.mxu2 %v1878_v13 }
  0x67   :  { %900 = vmatpush.bf16.msra.mxu3 %v1882_v14  ;;  %v2313_v14 = vld [vmem:[#allocation31_spill] sm:$0xff] }
  0x68   :  { %829 = vmatpush.bf16.msra.mxu0 %v2055_v19 }
  0x69   :  { %875 = vmatpush.bf16.msra.mxu1 %v1888_v16 }
  0x6a   :  { %888 = vmatpush.bf16.msra.mxu2 %v1890_v17 }
  0x6b   :  { %901 = vmatpush.bf16.msra.mxu3 %v1894_v18 }
  0x6c   :  { %830 = vmatpush.bf16.msra.mxu0 %v2097_v23 }
  0x6d   :  { %876 = vmatpush.bf16.msra.mxu1 %v1898_v20 }
  0x6e   :  { %889 = vmatpush.bf16.msra.mxu2 %v1902_v21 }
  0x6f   :  { %902 = vmatpush.bf16.msra.mxu3 %v1906_v22 }
  0x70   :  { %831 = vmatpush.bf16.msra.mxu0 %v2100_v27 }
  0x71   :  { %877 = vmatpush.bf16.msra.mxu1 %v1912_v24 }
  0x72   :  { %890 = vmatpush.bf16.msra.mxu2 %v1914_v25 }
  0x73   :  { %903 = vmatpush.bf16.msra.mxu3 %v1916_v26 }
  0x74   :  { %832 = vmatpush.bf16.msra.mxu0 %v2103_v44 }
  0x75   :  { %878 = vmatpush.bf16.msra.mxu1 %v1924_v30 }
  0x76   :  { %891 = vmatpush.bf16.msra.mxu2 %v1926_v31 }
  0x77   :  { %904 = vmatpush.bf16.msra.mxu3 %v1930_v34  ;;  %v2113_v34 = vld [vmem:[#allocation5 + $0x8] sm:$0xff] }
  0x78   :  { %910 = vmatpush.bf16.msrb.mxu0 %v1848_v3  ;;  %v849_v18 = vunpack.c.l.b16 %v2113_v34 }
  0x79   :  { %923 = vmatpush.bf16.msrb.mxu1 %v1934_v38 }
  0x7a   :  { %936 = vmatpush.bf16.msrb.mxu2 %v1936_v39  ;;  %v857_v10 = vpack.c.b16 %v849_v18, %v849_v18 }
  0x7b   :  { %949 = vmatpush.bf16.msrb.mxu3 %v1938_v40 }
  0x7c   :  { %911 = vmatpush.bf16.msrb.mxu0 %v1860_v7  ;;  %905 = vmatmul.bf16.vlgmr.msra.gmra.mxu3 %v857_v10  ;;  %v841_v10 = vld [vmem:[#allocation5 + $0x10] sm:$0xff] }
  0x7d   :  { %924 = vmatpush.bf16.msrb.mxu1 %v1948_v46 }
  0x7e   :  { %937 = vmatpush.bf16.msrb.mxu2 %v1950_v47 }
  0x7f   :  { %950 = vmatpush.bf16.msrb.mxu3 %v1954_v48 }
  0x80   :  { %912 = vmatpush.bf16.msrb.mxu0 %v1872_v11 }
  0x81   :  { %925 = vmatpush.bf16.msrb.mxu1 %v1960_v50 }
  0x82   :  { %938 = vmatpush.bf16.msrb.mxu2 %v1962_v51 }
  0x83   :  { %951 = vmatpush.bf16.msrb.mxu3 %v1966_v52 }
  0x84   :  { %913 = vmatpush.bf16.msrb.mxu0 %v1884_v15 }
  0x85   :  { %926 = vmatpush.bf16.msrb.mxu1 %v1972_v54 }
  0x86   :  { %939 = vmatpush.bf16.msrb.mxu2 %v1974_v55 }
  0x87   :  { %952 = vmatpush.bf16.msrb.mxu3 %v1978_v56  ;;  %v839_v56 = vld [vmem:[#allocation5] sm:$0xff] }
  0x88   :  { %914 = vmatpush.bf16.msrb.mxu0 %v2310_v45  ;;  %v848_v48 = vunpack.c.h.b16 %v839_v56  ;;  %v847_v6 = vunpack.c.l.b16 %v839_v56 }
  0x89   :  { %927 = vmatpush.bf16.msrb.mxu1 %v1984_v58 }
  0x8a   :  { %940 = vmatpush.bf16.msrb.mxu2 %v1986_v59  ;;  %v856_v22 = vpack.c.b16 %v848_v48, %v848_v48 }
  0x8b   :  { %953 = vmatpush.bf16.msrb.mxu3 %v1990_v60  ;;  %v2312_v60 = vld [vmem:[#allocation29_spill] sm:$0xff] }
  0x8c   :  { %892 = vmatmul.bf16.vlgmr.msra.gmra.mxu2 %v856_v22 }
  0x8d   :  { %928 = vmatpush.bf16.msrb.mxu1 %v1996_v62 }
  0x8e   :  { %941 = vmatpush.bf16.msrb.mxu2 %v1998_v63 }
  0x8f   :  { %954 = vmatpush.bf16.msrb.mxu3 %v2002_v28 }
  0x91   :  { %929 = vmatpush.bf16.msrb.mxu1 %v2008_v32 }
  0x92   :  { %942 = vmatpush.bf16.msrb.mxu2 %v2010_v33 }
  0x93   :  { %955 = vmatpush.bf16.msrb.mxu3 %v2014_v37  ;;  %v2311_v37 = vld [vmem:[#allocation27_spill] sm:$0xff] }
  0x94   :  { %915 = vmatpush.bf16.msrb.mxu0 %v2311_v37 }
  0x95   :  { %930 = vmatpush.bf16.msrb.mxu1 %v2020_v61 }
  0x96   :  { %943 = vmatpush.bf16.msrb.mxu2 %v2022_v57 }
  0x97   :  { %956 = vmatpush.bf16.msrb.mxu3 %v2026_v29 }
  0x98   :  { %916 = vmatpush.bf16.msrb.mxu0 %v2312_v60 }
  0x9a   :  { %1023 = vmatpush.bf16.msra.mxu2 %v1842_v0 }
  0x9b   :  { %1036 = vmatpush.bf16.msra.mxu3 %v1844_v1  ;;  %v2131_v1 = vld [vmem:[#allocation5 + $0x18] sm:$0xff] }
  0x9c   :  { %917 = vmatpush.bf16.msrb.mxu0 %v2313_v14 }
  0x9e   :  { %1024 = vmatpush.bf16.msra.mxu2 %v1852_v4 }
  0x9f   :  { %1037 = vmatpush.bf16.msra.mxu3 %v1854_v5 }
  0xa2   :  { %1025 = vmatpush.bf16.msra.mxu2 %v1864_v8  ;;  %v851_v8 = vunpack.c.l.b16 %v841_v10 }
  0xa3   :  { %1038 = vmatpush.bf16.msra.mxu3 %v1866_v9 }
  0xa6   :  { %1026 = vmatpush.bf16.msra.mxu2 %v1876_v12 }
  0xa7   :  { %1039 = vmatpush.bf16.msra.mxu3 %v1878_v13 }
  0xaa   :  { %1027 = vmatpush.bf16.msra.mxu2 %v1888_v16 }
  0xab   :  { %1040 = vmatpush.bf16.msra.mxu3 %v1890_v17 }
  0xae   :  { %1028 = vmatpush.bf16.msra.mxu2 %v1898_v20 }
  0xaf   :  { %1041 = vmatpush.bf16.msra.mxu3 %v1902_v21 }
  0xb2   :  { %1029 = vmatpush.bf16.msra.mxu2 %v1912_v24 }
  0xb3   :  { %1042 = vmatpush.bf16.msra.mxu3 %v1914_v25  ;;  %v2314_v25 = vld [vmem:[#allocation33_spill] sm:$0xff] }
  0xb4   :  { %v677_v36 = vpop.f32.mrf.mxu0 }
  0xb5   :  { %v690_v29 = vpop.f32.mrf.mxu1  ;;  %v678_v18 = vadd.f32 %v2121_v2, %v677_v36 }
  0xb6   :  { %1030 = vmatpush.bf16.msra.mxu2 %v1924_v30  ;;  %v2315_v30 = vld [vmem:[#allocation35_spill] sm:$0xff] }
  0xb7   :  { %v691_v0 = vadd.f32 %v690_v29, %v678_v18  ;;  %v859_v29 = vpack.c.b16 %v851_v8, %v851_v8  ;;  %1043 = vmatpush.bf16.msra.mxu3 %v1926_v31  ;;  %v850_v31 = vunpack.c.h.b16 %v2113_v34  ;;  %v2318_v34 = vld [vmem:[#allocation41_spill] sm:$0xff] }
  0xbc   :  { %v703_v28 = vpop.f32.mrf.mxu2  ;;  %v679_v40 = vpop.f32.mrf.mxu0 }
  0xbd   :  { %v716_v52 = vpop.f32.mrf.mxu3  ;;  %v692_v26 = vpop.f32.mrf.mxu1  ;;  %v855_v40 = vpack.c.b16 %v847_v6, %v847_v6  ;;  %v852_v6 = vunpack.c.h.b16 %v841_v10  ;;  %v704_v4 = vadd.f32 %v703_v28, %v691_v0 }
  0xbf   :  { %879 = vmatmul.bf16.vlgmr.msra.gmra.mxu1 %v855_v40  ;;  %v860_v22 = vpack.c.b16 %v852_v6, %v852_v6  ;;  %v717_v9 = vadd.f32 %v716_v52, %v704_v4 }
  0xc0   :  { %977 = vmatpush.bf16.msra.mxu1 %v2030_v35 }
  0xc1   :  { %944 = vmatmul.bf16.vlgmr.msrb.gmra.mxu2 %v860_v22 }
  0xc2   :  { %1075 = vmatpush.bf16.msrb.mxu2 %v1934_v38  ;;  %v2316_v38 = vld [vmem:[#allocation37_spill] sm:$0xff] }
  0xc4   :  { %v705_v41 = vpop.f32.mrf.mxu2  ;;  %978 = vmatpush.bf16.msra.mxu1 %v2037_v43 }
  0xc5   :  { %v718_v26 = vpop.f32.mrf.mxu3  ;;  %v853_v41 = vunpack.c.l.b16 %v2131_v1 }
  0xc6   :  { %1076 = vmatpush.bf16.msrb.mxu2 %v1948_v46  ;;  %v2320_v46 = vld [vmem:[#allocation46_spill] sm:$0xff] }
  0xc7   :  { %v861_v5 = vpack.c.b16 %v853_v41, %v853_v41 }
  0xc8   :  { %979 = vmatpush.bf16.msra.mxu1 %v2043_v49 }
  0xc9   :  { %957 = vmatmul.bf16.vlgmr.msrb.gmra.mxu3 %v861_v5 }
  0xca   :  { %1088 = vmatpush.bf16.msrb.mxu3 %v1936_v39  ;;  %1077 = vmatpush.bf16.msrb.mxu2 %v1960_v50  ;;  %v2322_v50 = vld [vmem:[#allocation21_spill] sm:$0xff] }
  0xcc   :  { %980 = vmatpush.bf16.msra.mxu1 %v2049_v53 }
  0xce   :  { %1089 = vmatpush.bf16.msrb.mxu3 %v1950_v47  ;;  %1078 = vmatpush.bf16.msrb.mxu2 %v1972_v54  ;;  %v2321_v47 = vld [vmem:[#allocation20_spill] sm:$0xff]  ;;  %v2324_v54 = vld [vmem:[#allocation23_spill] sm:$0xff] }
  0xcf   :  { %931 = vmatmul.bf16.vlgmr.msrb.gmra.mxu1 %v859_v29 }
  0xd0   :  { %981 = vmatpush.bf16.msra.mxu1 %v2055_v19 }
  0xd2   :  { %1090 = vmatpush.bf16.msrb.mxu3 %v1962_v51  ;;  %1079 = vmatpush.bf16.msrb.mxu2 %v1984_v58  ;;  %v2323_v51 = vld [vmem:[#allocation22_spill] sm:$0xff] }
  0xd3   :  { %v2326_v58 = vld [vmem:[#allocation26_spill] sm:$0xff] }
  0xd4   :  { %v729_v48 = vpop.f32.mrf.mxu0  ;;  %982 = vmatpush.bf16.msra.mxu1 %v2097_v23 }
  0xd5   :  { %v742_v56 = vpop.f32.mrf.mxu1  ;;  %v730_v12 = vadd.f32 %v729_v48, %v717_v9  ;;  %v2203_v9 = vld [vmem:[%s2241_s6] ss:$0 sm:$0xff] }
  0xd6   :  { %1091 = vmatpush.bf16.msrb.mxu3 %v1974_v55  ;;  %1080 = vmatpush.bf16.msrb.mxu2 %v1996_v62  ;;  %v2325_v55 = vld [vmem:[#allocation24_spill] sm:$0xff]  ;;  %v2332_v62 = vld [vmem:[#allocation38_spill] sm:$0xff] }
  0xd7   :  { %v743_v13 = vadd.f32 %v742_v56, %v730_v12  ;;  %v991_v56 = vld [vmem:[#allocation7] sm:$0xff] }
  0xd8   :  { %983 = vmatpush.bf16.msra.mxu1 %v2100_v27  ;;  %v999_v29 = vunpack.c.l.b16 %v991_v56 }
  0xda   :  { %1092 = vmatpush.bf16.msrb.mxu3 %v1986_v59  ;;  %1081 = vmatpush.bf16.msrb.mxu2 %v2008_v32  ;;  %v2327_v59 = vld [vmem:[#allocation28_spill] sm:$0xff]  ;;  %v2334_v32 = vld [vmem:[#allocation42_spill] sm:$0xff] }
  0xdc   :  { %v755_v28 = vpop.f32.mrf.mxu2  ;;  %v731_v52 = vpop.f32.mrf.mxu0  ;;  %984 = vmatpush.bf16.msra.mxu1 %v2103_v44 }
  0xdd   :  { %v768_v36 = vpop.f32.mrf.mxu3  ;;  %v756_v16 = vadd.f32 %v755_v28, %v743_v13  ;;  %v744_v40 = vpop.f32.mrf.mxu1  ;;  %v1007_v28 = vpack.c.b16 %v999_v29, %v999_v29 }
  0xde   :  { %1093 = vmatpush.bf16.msrb.mxu3 %v1998_v63  ;;  %1082 = vmatpush.bf16.msrb.mxu2 %v2020_v61  ;;  %v2331_v61 = vld [vmem:[#allocation36_spill] sm:$0xff] }
  0xdf   :  { %v769_v17 = vadd.f32 %v768_v36, %v756_v16  ;;  %v2333_v63 = vld [vmem:[#allocation40_spill] sm:$0xff]  ;;  %v1000_v36 = vunpack.c.h.b16 %v991_v56  ;;  %1031 = vmatmul.bf16.vlgmr.msra.gmra.mxu2 %v1007_v28 }
  0xe0   :  { %1062 = vmatpush.bf16.msrb.mxu1 %v1848_v3  ;;  %v858_v3 = vpack.c.b16 %v850_v31, %v850_v31 }
  0xe1   :  { %v772_v20 = vmax.f32 %v769_v17, 0.0  ;;  %v1008_v16 = vpack.c.b16 %v1000_v36, %v1000_v36  ;;  %v992_v17 = vld [vmem:[#allocation7 + $0x8] sm:$0xff] }
  0xe2   :  { %1094 = vmatpush.bf16.msrb.mxu3 %v2010_v33  ;;  %v2335_v33 = vld [vmem:[#allocation44_spill] sm:$0xff]  ;;  %1129 = vmatpush.bf16.msra.mxu2 %v2030_v35 }
  0xe3   :  { %v773_v21 = vpack.c.bf16 %v772_v20, %v772_v20  ;;  %1044 = vmatmul.bf16.vlgmr.msra.gmra.mxu3 %v1008_v16  ;;  %v1001_v20 = vunpack.c.l.b16 %v992_v17 }
  0xe4   :  { %v757_v26 = vpop.f32.mrf.mxu2  ;;  %1063 = vmatpush.bf16.msrb.mxu1 %v1860_v7  ;;  %v2317_v7 = vld [vmem:[#allocation39_spill] sm:$0xff] }
  0xe5   :  { %v770_v24 = vpop.f32.mrf.mxu3  ;;  %833 = vmatmul.bf16.vlgmr.msra.gmra.mxu0 %v773_v21  ;;  %v1009_v26 = vpack.c.b16 %v1001_v20, %v1001_v20 }
  0xe6   :  { %962 = vmatpush.bf16.msra.mxu0 %v2314_v25  ;;  %1095 = vmatpush.bf16.msrb.mxu3 %v2022_v57  ;;  %v2328_v57 = vld [vmem:[#allocation30_spill] sm:$0xff]  ;;  %v993_v24 = vld [vmem:[#allocation7 + $0x10] sm:$0xff] }
  0xe7   :  { %1130 = vmatpush.bf16.msra.mxu2 %v2037_v43 }
  0xe8   :  { %1064 = vmatpush.bf16.msrb.mxu1 %v1872_v11  ;;  %v2319_v11 = vld [vmem:[#allocation43_spill] sm:$0xff] }
  0xea   :  { %963 = vmatpush.bf16.msra.mxu0 %v2315_v30 }
  0xeb   :  { %1131 = vmatpush.bf16.msra.mxu2 %v2043_v49 }
  0xec   :  { %1065 = vmatpush.bf16.msrb.mxu1 %v1884_v15  ;;  %v854_v15 = vunpack.c.h.b16 %v2131_v1 }
  0xee   :  { %964 = vmatpush.bf16.msra.mxu0 %v2316_v38  ;;  %v862_v39 = vpack.c.b16 %v854_v15, %v854_v15 }
  0xef   :  { %1132 = vmatpush.bf16.msra.mxu2 %v2049_v53 }
  0xf0   :  { %1066 = vmatpush.bf16.msrb.mxu1 %v2310_v45 }
  0xf2   :  { %965 = vmatpush.bf16.msra.mxu0 %v2317_v7 }
  0xf3   :  { %1133 = vmatpush.bf16.msra.mxu2 %v2055_v19 }
  0xf4   :  { %1067 = vmatpush.bf16.msrb.mxu1 %v2311_v37  ;;  %v2336_v37 = vld [vmem:[#allocation45_spill] sm:$0xff] }
  0xf5   :  { %918 = vmatmul.bf16.vlgmr.msrb.gmra.mxu0 %v858_v3  ;;  %v1003_v3 = vunpack.c.l.b16 %v993_v24 }
  0xf6   :  { %966 = vmatpush.bf16.msra.mxu0 %v2318_v34 }
  0xf7   :  { %v1011_v35 = vpack.c.b16 %v1003_v3, %v1003_v3  ;;  %1134 = vmatpush.bf16.msra.mxu2 %v2097_v23  ;;  %v1002_v23 = vunpack.c.h.b16 %v992_v17 }
  0xf8   :  { %1068 = vmatpush.bf16.msrb.mxu1 %v2312_v60  ;;  %v2330_v60 = vld [vmem:[#allocation34_spill] sm:$0xff] }
  0xf9   :  { %1083 = vmatmul.bf16.vlgmr.msrb.gmra.mxu2 %v1011_v35 }
  0xfa   :  { %967 = vmatpush.bf16.msra.mxu0 %v2319_v11 }
  0xfb   :  { %1135 = vmatpush.bf16.msra.mxu2 %v2100_v27 }
  0xfc   :  { %1069 = vmatpush.bf16.msrb.mxu1 %v2313_v14  ;;  %v2329_v14 = vld [vmem:[#allocation32_spill] sm:$0xff] }
  0xfe   :  { %968 = vmatpush.bf16.msra.mxu0 %v2016_v42 }
  0xff   :  { %v906_v0 = vpop.f32.mrf.mxu3  ;;  %1136 = vmatpush.bf16.msra.mxu2 %v2103_v44 }
 0x102   :  { %969 = vmatpush.bf16.msra.mxu0 %v2320_v46 }
 0x105   :  { %970 = vmatmul.bf16.vlgmr.msra.gmra.mxu0 %v862_v39  ;;  %v1004_v39 = vunpack.c.h.b16 %v993_v24 }
 0x106   :  { %1049 = vmatpush.bf16.msrb.mxu0 %v2321_v47 }
 0x107   :  { %v908_v1 = vpop.f32.mrf.mxu3 }
 0x10a   :  { %1050 = vmatpush.bf16.msrb.mxu0 %v2322_v50  ;;  %v1012_v50 = vpack.c.b16 %v1004_v39, %v1004_v39 }
 0x10c   :  { %1096 = vmatmul.bf16.vlgmr.msrb.gmra.mxu3 %v1012_v50 }
 0x10e   :  { %1051 = vmatpush.bf16.msrb.mxu0 %v2323_v51 }
 0x10f   :  { %v893_v18 = vpop.f32.mrf.mxu2 }
 0x112   :  { %1052 = vmatpush.bf16.msrb.mxu0 %v2324_v54  ;;  %v994_v54 = vld [vmem:[#allocation7 + $0x18] sm:$0xff] }
 0x113   :  { %v1005_v49 = vunpack.c.l.b16 %v994_v54  ;;  %v1006_v27 = vunpack.c.h.b16 %v994_v54 }
 0x115   :  { %v1014_v44 = vpack.c.b16 %v1006_v27, %v1006_v27 }
 0x116   :  { %1053 = vmatpush.bf16.msrb.mxu0 %v2325_v55 }
 0x117   :  { %v895_v6 = vpop.f32.mrf.mxu2 }
 0x11a   :  { %1054 = vmatpush.bf16.msrb.mxu0 %v2326_v58  ;;  %v1013_v58 = vpack.c.b16 %v1005_v49, %v1005_v49 }
 0x11e   :  { %1055 = vmatpush.bf16.msrb.mxu0 %v2327_v59 }
 0x122   :  { %1056 = vmatpush.bf16.msrb.mxu0 %v2328_v57 }
 0x125   :  { %1057 = vmatmul.bf16.vlgmr.msrb.gmra.mxu0 %v1009_v26 }
 0x126   :  { %1101 = vmatpush.bf16.msra.mxu0 %v2329_v14 }
 0x12a   :  { %1102 = vmatpush.bf16.msra.mxu0 %v2330_v60 }
 0x12e   :  { %1103 = vmatpush.bf16.msra.mxu0 %v2331_v61  ;;  %v1010_v61 = vpack.c.b16 %v1002_v23, %v1002_v23 }
 0x132   :  { %1104 = vmatpush.bf16.msra.mxu0 %v2332_v62 }
 0x136   :  { %1105 = vmatpush.bf16.msra.mxu0 %v2333_v63 }
 0x13a   :  { %1106 = vmatpush.bf16.msra.mxu0 %v2334_v32 }
 0x13c   :  { %v880_v45 = vpop.f32.mrf.mxu1 }
 0x13d   :  { %v881_v52 = vadd.f32 %v2121_v2, %v880_v45 }
 0x13e   :  { %1107 = vmatpush.bf16.msra.mxu0 %v2335_v33 }
 0x13f   :  { %v894_v21 = vadd.f32 %v893_v18, %v881_v52 }
 0x141   :  { %v907_v31 = vadd.f32 %v906_v0, %v894_v21 }
 0x142   :  { %1108 = vmatpush.bf16.msra.mxu0 %v2336_v37 }
 0x144   :  { %v882_v10 = vpop.f32.mrf.mxu1  ;;  %v945_v22 = vpop.f32.mrf.mxu2 }
 0x145   :  { %1109 = vmatmul.bf16.vlgmr.msra.gmra.mxu0 %v1013_v58 }
 0x14c   :  { %v932_v4 = vpop.f32.mrf.mxu1  ;;  %v958_v41 = vpop.f32.mrf.mxu3 }
 0x14d   :  { %v947_v8 = vpop.f32.mrf.mxu2 }
 0x154   :  { %v934_v5 = vpop.f32.mrf.mxu1  ;;  %v960_v48 = vpop.f32.mrf.mxu3 }
 0x162   :  { %v834_v12 = vpop.f32.mrf.mxu0 }
 0x163   :  { %v835_v13 = vadd.f32 %v2203_v9, %v834_v12 }
 0x165   :  { %838 = vst [vmem:[#allocation11] sm:$0xff] %v835_v13 }
 0x166   :  { %1153 = dma.vmem_to_hbm [thread:$0]  %s1149_s18, 128, %s1151_s21, [#allocation4]  }
 0x16a   :  { %v836_v40 = vpop.f32.mrf.mxu0 }
 0x172   :  { %v919_v15 = vpop.f32.mrf.mxu0 }
 0x173   :  { %v920_v47 = vadd.f32 %v919_v15, %v907_v31 }
 0x175   :  { %v933_v43 = vadd.f32 %v932_v4, %v920_v47 }
 0x177   :  { %v946_v55 = vadd.f32 %v945_v22, %v933_v43 }
 0x179   :  { %v959_v53 = vadd.f32 %v958_v41, %v946_v55 }
 0x17a   :  { %v921_v51 = vpop.f32.mrf.mxu0 }
 0x182   :  { %v971_v59 = vpop.f32.mrf.mxu0 }
 0x183   :  { %v972_v57 = vadd.f32 %v971_v59, %v959_v53 }
 0x185   :  { %v975_v14 = vmax.f32 %v972_v57, 0.0 }
 0x187   :  { %v976_v60 = vpack.c.bf16 %v975_v14, %v975_v14 }
 0x189   :  { %985 = vmatmul.bf16.vlgmr.msra.gmra.mxu1 %v976_v60 }
 0x18a   :  { %v973_v19 = vpop.f32.mrf.mxu0  ;;  %1114 = vmatpush.bf16.msra.mxu1 %v2314_v25  ;;  %v1032_v25 = vpop.f32.mrf.mxu2 }
 0x18e   :  { %1115 = vmatpush.bf16.msra.mxu1 %v2315_v30  ;;  %v1045_v30 = vpop.f32.mrf.mxu3 }
 0x192   :  { %1116 = vmatpush.bf16.msra.mxu1 %v2316_v38  ;;  %v1034_v63 = vpop.f32.mrf.mxu2 }
 0x196   :  { %1117 = vmatpush.bf16.msra.mxu1 %v2317_v7  ;;  %v1047_v38 = vpop.f32.mrf.mxu3 }
 0x199   :  { %1070 = vmatmul.bf16.vlgmr.msrb.gmra.mxu1 %v1010_v61 }
 0x19a   :  { %1118 = vmatpush.bf16.msra.mxu1 %v2318_v34  ;;  %v1084_v33 = vpop.f32.mrf.mxu2 }
 0x19e   :  { %1119 = vmatpush.bf16.msra.mxu1 %v2319_v11  ;;  %v1097_v7 = vpop.f32.mrf.mxu3 }
 0x1a2   :  { %1120 = vmatpush.bf16.msra.mxu1 %v2016_v42  ;;  %v1058_v62 = vpop.f32.mrf.mxu0  ;;  %v1086_v45 = vpop.f32.mrf.mxu2  ;;  %v1033_v42 = vadd.f32 %v2121_v2, %v1032_v25 }
 0x1a4   :  { %v1046_v10 = vadd.f32 %v1045_v30, %v1033_v42 }
 0x1a6   :  { %1121 = vmatpush.bf16.msra.mxu1 %v2320_v46  ;;  %v1099_v34 = vpop.f32.mrf.mxu3  ;;  %v1059_v6 = vadd.f32 %v1058_v62, %v1046_v10 }
 0x1a9   :  { %1122 = vmatmul.bf16.vlgmr.msra.gmra.mxu1 %v1014_v44 }
 0x1aa   :  { %v1060_v32 = vpop.f32.mrf.mxu0 }
 0x1c2   :  { %v1110_v37 = vpop.f32.mrf.mxu0 }
 0x1ca   :  { %v1112_v18 = vpop.f32.mrf.mxu0 }
 0x206   :  { %v986_v11 = vpop.f32.mrf.mxu1 }
 0x207   :  { %v987_v0 = vadd.f32 %v2203_v9, %v986_v11 }
 0x209   :  { %990 = vst [vmem:[#allocation12] sm:$0xff] %v987_v0 }
 0x20a   :  { %1164 = dma.vmem_to_hbm [thread:$0]  %s1160_s16, 128, %s1162_s14, [#allocation13]  }
 0x20e   :  { %v988_v46 = vpop.f32.mrf.mxu1 }
 0x216   :  { %v1071_v1 = vpop.f32.mrf.mxu1 }
 0x217   :  { %v1072_v4 = vadd.f32 %v1071_v1, %v1059_v6 }
 0x219   :  { %v1085_v22 = vadd.f32 %v1084_v33, %v1072_v4 }
 0x21b   :  { %v1098_v5 = vadd.f32 %v1097_v7, %v1085_v22 }
 0x21d   :  { %v1111_v8 = vadd.f32 %v1110_v37, %v1098_v5 }
 0x21e   :  { %v1073_v41 = vpop.f32.mrf.mxu1 }
 0x226   :  { %v1123_v48 = vpop.f32.mrf.mxu1 }
 0x227   :  { %v1124_v56 = vadd.f32 %v1123_v48, %v1111_v8 }
 0x229   :  { %v1127_v29 = vmax.f32 %v1124_v56, 0.0 }
 0x22b   :  { %v1128_v12 = vpack.c.bf16 %v1127_v29, %v1127_v29 }
 0x22d   :  { %1137 = vmatmul.bf16.vlgmr.msra.gmra.mxu2 %v1128_v12 }
 0x22e   :  { %v1125_v13 = vpop.f32.mrf.mxu1 }
 0x2b0   :  { %v1138_v2 = vpop.f32.mrf.mxu2 }
 0x2b1   :  { %v1139_v28 = vadd.f32 %v2203_v9, %v1138_v2 }
 0x2b3   :  { %1142 = vst [vmem:[#allocation14] sm:$0xff] %v1139_v28 }
 0x2b4   :  { %1175 = dma.vmem_to_hbm [thread:$0]  %s1171_s1, 128, %s1173_s8, [#allocation13]  }
 0x2b8   :  { %v1140_v36 = vpop.f32.mrf.mxu2 }
 0x2b9   :  { %1763 = dma.done.wait [#allocation4], 128  }
 0x2ba   :  { %1764 = vsyncadd [#allocation4], 4294967168 }
 0x2bb   :  { %1765 = dma.done.wait [#allocation13], 256  }
 0x2bc   :  { %1766 = vsyncadd [#allocation13], 4294967040 }
 0x2bd   :  { %1188 = vsyncpa [#allocation3], 1 }
 0x2be   :  { %1189 = vsyncpa [#allocation6], 1 }
 0x2bf   :  { %1190 = vsyncpa [#allocation9], 1 }
 0x2c0   :  { %1191 = vsyncpa [#allocation4], 1 }
 0x2c1   :  { %1192 = vsyncpa [#allocation13], 1 }

</bundles_post_ra>
